<compile_context>
chip_gen: v5e
topology: v5e:2x2
jax: 0.10.0
libtpu: 0.0.40
codegen_flags: <defaults>
</compile_context>

<pallas_src>
import jax
import jax.numpy as jnp
from jax.experimental import pallas as pl
from jax.experimental.pallas import tpu as pltpu

HIDDEN = 1024                 # nn.LSTM(input_size=1, hidden_size=1024)
N_CHUNKS = 2                  # hidden-dim chunks for the general path (hc=512)
VMEM_LIMIT = 24 * 1024 * 1024


# ----------------------------------------------------------------------------
# Kernels
# ----------------------------------------------------------------------------
def _zero_state_score_kernel(x_ref, wih_ref, b_ref, wfc_ref, bfc_ref,
                             score_ref):
    """Fast path: h0 == c0 == 0 (the module's actual call pattern).

    gates = x * W_ih^T + (b_ih + b_hh) with the dead forget-gate columns
    removed host-side (layout [i|g|o]); the 8 MiB W_hh stream is skipped.
    """
    x = x_ref[...]                                   # (B, 1)
    gates = x * wih_ref[...] + b_ref[...]            # (B, 3H) via VPU broadcast
    H = wfc_ref.shape[-1]
    i_g = jax.nn.sigmoid(gates[:, 0 * H:1 * H])
    g_g = jnp.tanh(gates[:, 1 * H:2 * H])
    o_g = jax.nn.sigmoid(gates[:, 2 * H:3 * H])
    c_new = i_g * g_g                                # f_g * c0 == 0 dropped
    h_new = o_g * jnp.tanh(c_new)                    # (B, H)
    # fc(1024 -> 1): VPU multiply + lane reduction instead of an N=1 matmul.
    out = jnp.sum(h_new * wfc_ref[...], axis=-1, keepdims=True) + bfc_ref[...]
    out = jnp.maximum(out, 0.0)                      # dropout(eval)=id, relu
    score_ref[...] = jax.nn.sigmoid(out)


def _lstm_fc_chunk_kernel(x_ref, h_ref, c_ref, wih_ref, whh_q_ref, scale_ref,
                          b_ref, wfc_ref, part_ref):
    """General single LSTM step + fused fc partial, tiled over the hidden dim.

    Block shapes per grid step j (hc = H // N_CHUNKS):
      x_ref    : (B, 1)        h_ref    : (B, H)       c_ref   : (B, hc)
      wih_ref  : (1, 4*hc)     whh_q_ref: (H, 4*hc) i8  scale_ref: (1, 4*hc)
      b_ref    : (1, 4*hc)     wfc_ref  : (1, hc)       part_ref: (B, 128)
    Chunk j's gate columns are [i_j | f_j | g_j | o_j] (host-side relayout).
    """
    x = x_ref[...]                                   # (B, 1)
    h = h_ref[...]                                   # (B, H)
    c = c_ref[...]                                   # (B, hc)
    # Dequantize the int8 weight chunk on the VPU; scales folded in after the
    # matmul (per output column).  No MXU int8 needed -> works on v7x too.
    w = whh_q_ref[...].astype(jnp.float32)           # (H, 4*hc)
    gates_hh = jnp.dot(h, w, preferred_element_type=jnp.float32) * scale_ref[...]
    gates = x * wih_ref[...] + gates_hh + b_ref[...]  # (B, 4*hc)
    hc = c.shape[-1]
    i_g = jax.nn.sigmoid(gates[:, 0 * hc:1 * hc])
    f_g = jax.nn.sigmoid(gates[:, 1 * hc:2 * hc])
    g_g = jnp.tanh(gates[:, 2 * hc:3 * hc])
    o_g = jax.nn.sigmoid(gates[:, 3 * hc:4 * hc])
    c_new = f_g * c + i_g * g_g
    h_new = o_g * jnp.tanh(c_new)                    # (B, hc)
    # Fused fc(1024 -> 1) partial for this hidden slice: VPU mul + lane reduce,
    # broadcast into a lane-dense 128-wide output block (unmasked store).
    partial = jnp.sum(h_new * wfc_ref[...], axis=-1, keepdims=True)  # (B, 1)
    part_ref[...] = jnp.broadcast_to(partial, part_ref.shape)


# ----------------------------------------------------------------------------
# Wrappers
# ----------------------------------------------------------------------------
def _full_spec(shape):
    # whole array resident in VMEM as a single block (grid is empty)
    return pl.BlockSpec(shape, lambda: (0,) * len(shape))


def evaluate_response_scores(x, h0, c0, params, *, assume_zero_state=False,
                             debug_check_state=False):
    """sigmoid(relu(fc(LSTM_step(x; h0, c0)))) for a batch of responses.

    x : (B, 1) float32 word counts.  h0/c0 : (B, H) initial state.
    assume_zero_state=True skips the W_hh stream; caller must guarantee
    h0 == c0 == 0 (the module's evaluate_response always does).
    """
    B = x.shape[0]
    H = h0.shape[-1]

    if assume_zero_state:
        if debug_check_state:
            # Eager-only guard against silently-wrong fast-path results.
            assert bool(jnp.all(h0 == 0.0)) and bool(jnp.all(c0 == 0.0)), (
                "assume_zero_state=True requires h0 == c0 == 0")
        cost_fast = pl.CostEstimate(
            flops=10 * B * 3 * H,
            transcendentals=4 * B * H + B,
            bytes_accessed=(3 * H * 4 * 2 + H * 4 + 4 + B * 8))
        return pl.pallas_call(
            _zero_state_score_kernel,
            out_shape=jax.ShapeDtypeStruct((B, 1), jnp.float32),
            in_specs=[_full_spec(x.shape),
                      _full_spec(params["w_ih_igo"].shape),
                      _full_spec(params["b_igo"].shape),
                      _full_spec(params["w_fc"].shape),
                      _full_spec(params["b_fc"].shape)],
            out_specs=_full_spec((B, 1)),
            cost_estimate=cost_fast,
        )(x, params["w_ih_igo"], params["b_igo"], params["w_fc"],
          params["b_fc"])

    n_chunks = params["n_chunks"]
    hc = H // n_chunks
    cost = pl.CostEstimate(
        flops=2 * B * H * 4 * H + 8 * B * 4 * H,
        transcendentals=5 * B * H,
        bytes_accessed=(H * 4 * H * 1              # int8 W_hh stream (dominant)
                        + 3 * 4 * H * 4            # w_ih + scales + bias
                        + n_chunks * B * H * 4     # h re-read per chunk
                        + 2 * B * H * 4            # c in (+ slack)
                        + H * 4                    # w_fc
                        + B * n_chunks * 128 * 4)) # fc partials out

    partials = pl.pallas_call(
        _lstm_fc_chunk_kernel,
        out_shape=jax.ShapeDtypeStruct((B, n_chunks * 128), jnp.float32),
        grid=(n_chunks,),
        in_specs=[
            pl.BlockSpec((B, 1), lambda j: (0, 0)),
            pl.BlockSpec((B, H), lambda j: (0, 0)),
            pl.BlockSpec((B, hc), lambda j: (0, j)),
            pl.BlockSpec((1, 4 * hc), lambda j: (0, j)),
            pl.BlockSpec((H, 4 * hc), lambda j: (0, j)),
            pl.BlockSpec((1, 4 * hc), lambda j: (0, j)),
            pl.BlockSpec((1, 4 * hc), lambda j: (0, j)),
            pl.BlockSpec((1, hc), lambda j: (0, j)),
        ],
        out_specs=pl.BlockSpec((B, 128), lambda j: (0, j)),
        compiler_params=pltpu.CompilerParams(
            dimension_semantics=("parallel",),      # v7x: one chunk per TC
            vmem_limit_bytes=VMEM_LIMIT),
        cost_estimate=cost,
    )(x, h0, c0, params["w_ih_cl"], params["w_hh_q_cl"], params["scale_cl"],
      params["b_cl"], params["w_fc"])

    # Trivial epilogue (fuses into surrounding XLA): gather per-chunk partials,
    # add bias, relu, sigmoid.
    part = partials.reshape(B, n_chunks, 128)[:, :, 0]          # (B, n_chunks)
    out = jnp.sum(part, axis=-1, keepdims=True) + params["b_fc"]
    return jax.nn.sigmoid(jnp.maximum(out, 0.0))


# ----------------------------------------------------------------------------
# Parameters / reference
# ----------------------------------------------------------------------------
def _to_chunk_layout(a, n_chunks):
    """Permute the 4H axis [i|f|g|o] so chunk j holds [i_j|f_j|g_j|o_j]."""
    lead = a.shape[:-1]
    four_h = a.shape[-1]
    hidden = four_h // 4
    hc = hidden // n_chunks
    a = a.reshape(*lead, 4, n_chunks, hc)
    a = jnp.swapaxes(a, -3, -2)
    return a.reshape(*lead, four_h)


def _drop_forget_gate(a, hidden):
    """[i|f|g|o] (1, 4H) -> [i|g|o] (1, 3H)."""
    return jnp.concatenate(
        [a[:, 0 * hidden:1 * hidden],
         a[:, 2 * hidden:3 * hidden],
         a[:, 3 * hidden:4 * hidden]], axis=-1)


def init_params(key, hidden=HIDDEN, n_chunks=N_CHUNKS):
    """PyTorch-default-style init U(-1/sqrt(H), 1/sqrt(H)), transposed layout."""
    ks = jax.random.split(key, 6)
    bound = 1.0 / jnp.sqrt(jnp.float32(hidden))
    w_ih = jax.random.uniform(ks[0], (1, 4 * hidden), jnp.float32, -bound, bound)
    w_hh = jax.random.uniform(ks[1], (hidden, 4 * hidden), jnp.float32, -bound, bound)
    b_ih = jax.random.uniform(ks[2], (1, 4 * hidden), jnp.float32, -bound, bound)
    b_hh = jax.random.uniform(ks[3], (1, 4 * hidden), jnp.float32, -bound, bound)
    w_fc = jax.random.uniform(ks[4], (1, hidden), jnp.float32, -bound, bound)
    b_fc = jax.random.uniform(ks[5], (1, 1), jnp.float32, -bound, bound)
    b = b_ih + b_hh

    # int8 per-output-column symmetric quantization of W_hh.
    scale = jnp.maximum(jnp.max(jnp.abs(w_hh), axis=0, keepdims=True), 1e-8) / 127.0
    w_hh_q = jnp.clip(jnp.round(w_hh / scale), -127.0, 127.0).astype(jnp.int8)

    return {
        # general path (chunk layout along 4H)
        "w_ih_cl": _to_chunk_layout(w_ih, n_chunks),
        "b_cl": _to_chunk_layout(b, n_chunks),
        "w_hh_q_cl": _to_chunk_layout(w_hh_q, n_chunks),
        "scale_cl": _to_chunk_layout(scale, n_chunks),
        "n_chunks": n_chunks,
        # zero-state fast path (forget gate removed host-side)
        "w_ih_igo": _drop_forget_gate(w_ih, hidden),
        "b_igo": _drop_forget_gate(b, hidden),
        # shared head
        "w_fc": w_fc, "b_fc": b_fc,
        # f32 natural layout, reference check only
        "w_ih": w_ih, "b": b, "w_hh_ref": w_hh,
    }


def _reference_scores(x, h0, c0, p):
    """Pure-JAX reference of the PyTorch evaluate_response math."""
    gates = x @ p["w_ih"] + h0 @ p["w_hh_ref"] + p["b"]
    H = h0.shape[-1]
    i_g = jax.nn.sigmoid(gates[:, 0 * H:1 * H])
    f_g = jax.nn.sigmoid(gates[:, 1 * H:2 * H])
    g_g = jnp.tanh(gates[:, 2 * H:3 * H])
    o_g = jax.nn.sigmoid(gates[:, 3 * H:4 * H])
    c_new = f_g * c0 + i_g * g_g
    h_new = o_g * jnp.tanh(c_new)
    out = jnp.sum(h_new * p["w_fc"], axis=-1, keepdims=True) + p["b_fc"]
    return jax.nn.sigmoid(jnp.maximum(out, 0.0))


# ----------------------------------------------------------------------------
# Harness
# ----------------------------------------------------------------------------
if __name__ == "__main__":
    key = jax.random.PRNGKey(0)
    k_param, k_len, k_h, k_c = jax.random.split(key, 4)

    params = init_params(k_param)

    # Two "responses": word counts are the LSTM input feature
    # (torch.tensor([len(response.split())]) -> (B, seq=1, feat=1) -> (B, 1)).
    B = 2
    word_counts = jax.random.randint(k_len, (B, 1), 3, 9).astype(jnp.float32)
    h0 = jnp.zeros((B, HIDDEN), jnp.float32)
    c0 = jnp.zeros((B, HIDDEN), jnp.float32)

    # Fast path: module always calls with h0 = c0 = 0 -> skip W_hh entirely.
    scores_fast = evaluate_response_scores(word_counts, h0, c0, params,
                                           assume_zero_state=True,
                                           debug_check_state=True)
    # General path on the same inputs (exercises the chunked int8 W_hh pipeline
    # with the fused fc head).
    scores_gen = evaluate_response_scores(word_counts, h0, c0, params)
    jax.block_until_ready((scores_fast, scores_gen))

    ref0 = _reference_scores(word_counts, h0, c0, params)
    assert scores_fast.shape == (B, 1) and scores_gen.shape == (B, 1)
    assert bool(jnp.all(jnp.isfinite(scores_fast)))
    assert bool(jnp.all((scores_fast >= 0.0) & (scores_fast <= 1.0)))
    assert bool(jnp.allclose(scores_fast, ref0, atol=1e-3))
    assert bool(jnp.allclose(scores_gen, ref0, atol=1e-3))

    # General path with non-zero state (int8 W_hh vs f32 reference tolerance).
    h_r = 0.1 * jax.random.normal(k_h, (B, HIDDEN), jnp.float32)
    c_r = 0.1 * jax.random.normal(k_c, (B, HIDDEN), jnp.float32)
    scores_nz = evaluate_response_scores(word_counts, h_r, c_r, params)
    jax.block_until_ready(scores_nz)
    ref_nz = _reference_scores(word_counts, h_r, c_r, params)
    assert bool(jnp.all(jnp.isfinite(scores_nz)))
    assert bool(jnp.allclose(scores_nz, ref_nz, atol=2e-2))

    print("KERNEL_OK")
</pallas_src>

<mosaic_0001>
module attributes {stable_mosaic.version = 11 : i64} {
  func.func @_zero_state_score_kernel(%arg0: memref<2x1xf32, #tpu.memory_space<vmem>>, %arg1: memref<1x3072xf32, #tpu.memory_space<vmem>>, %arg2: memref<1x3072xf32, #tpu.memory_space<vmem>>, %arg3: memref<1x1024xf32, #tpu.memory_space<vmem>>, %arg4: memref<1x1xf32, #tpu.memory_space<vmem>>, %arg5: memref<2x1xf32, #tpu.memory_space<vmem>>) attributes {dimension_semantics = [], scalar_prefetch = 0 : i64, scratch_operands = 0 : i64, tpu.core_type = #tpu.core_type<tc>} {
    %c0 = arith.constant 0 : index
    %c0_0 = arith.constant 0 : index
    %0 = vector.load %arg0[%c0, %c0_0] : memref<2x1xf32, #tpu.memory_space<vmem>>, vector<2x1xf32>
    %c0_1 = arith.constant 0 : index
    %c0_2 = arith.constant 0 : index
    %1 = vector.load %arg1[%c0_1, %c0_2] : memref<1x3072xf32, #tpu.memory_space<vmem>>, vector<1x3072xf32>
    %2 = vector.broadcast %0 : vector<2x1xf32> to vector<2x3072xf32>
    %3 = vector.broadcast %1 : vector<1x3072xf32> to vector<2x3072xf32>
    %4 = arith.mulf %2, %3 : vector<2x3072xf32>
    %c0_3 = arith.constant 0 : index
    %c0_4 = arith.constant 0 : index
    %5 = vector.load %arg2[%c0_3, %c0_4] : memref<1x3072xf32, #tpu.memory_space<vmem>>, vector<1x3072xf32>
    %6 = vector.broadcast %5 : vector<1x3072xf32> to vector<2x3072xf32>
    %7 = arith.addf %4, %6 : vector<2x3072xf32>
    %8 = vector.extract_strided_slice %7 {offsets = [0, 0], sizes = [2, 1024], strides = [1, 1]} : vector<2x3072xf32> to vector<2x1024xf32>
    %9 = arith.negf %8 : vector<2x1024xf32>
    %10 = math.exp %9 : vector<2x1024xf32>
    %cst = arith.constant 1.000000e+00 : f32
    %11 = vector.broadcast %cst : f32 to vector<2x1024xf32>
    %12 = arith.addf %11, %10 : vector<2x1024xf32>
    %13 = arith.divf %11, %12 : vector<2x1024xf32>
    %14 = vector.extract_strided_slice %7 {offsets = [0, 1024], sizes = [2, 1024], strides = [1, 1]} : vector<2x3072xf32> to vector<2x1024xf32>
    %15 = math.tanh %14 : vector<2x1024xf32>
    %16 = vector.extract_strided_slice %7 {offsets = [0, 2048], sizes = [2, 1024], strides = [1, 1]} : vector<2x3072xf32> to vector<2x1024xf32>
    %17 = arith.negf %16 : vector<2x1024xf32>
    %18 = math.exp %17 : vector<2x1024xf32>
    %cst_5 = arith.constant 1.000000e+00 : f32
    %19 = vector.broadcast %cst_5 : f32 to vector<2x1024xf32>
    %20 = arith.addf %19, %18 : vector<2x1024xf32>
    %21 = arith.divf %19, %20 : vector<2x1024xf32>
    %22 = arith.mulf %13, %15 : vector<2x1024xf32>
    %23 = math.tanh %22 : vector<2x1024xf32>
    %24 = arith.mulf %21, %23 : vector<2x1024xf32>
    %c0_6 = arith.constant 0 : index
    %c0_7 = arith.constant 0 : index
    %25 = vector.load %arg3[%c0_6, %c0_7] : memref<1x1024xf32, #tpu.memory_space<vmem>>, vector<1x1024xf32>
    %26 = vector.broadcast %25 : vector<1x1024xf32> to vector<2x1024xf32>
    %27 = arith.mulf %24, %26 : vector<2x1024xf32>
    %cst_8 = arith.constant dense<0.000000e+00> : vector<2xf32>
    %28 = vector.multi_reduction <add>, %27, %cst_8 [1] : vector<2x1024xf32> to vector<2xf32>
    %29 = vector.shape_cast %28 : vector<2xf32> to vector<2x1xf32>
    %c0_9 = arith.constant 0 : index
    %c0_10 = arith.constant 0 : index
    %30 = vector.load %arg4[%c0_9, %c0_10] : memref<1x1xf32, #tpu.memory_space<vmem>>, vector<1x1xf32>
    %31 = vector.broadcast %30 : vector<1x1xf32> to vector<2x1xf32>
    %32 = arith.addf %29, %31 : vector<2x1xf32>
    %cst_11 = arith.constant 0.000000e+00 : f32
    %33 = vector.broadcast %cst_11 : f32 to vector<2x1xf32>
    %34 = arith.maximumf %32, %33 : vector<2x1xf32>
    %35 = arith.negf %34 : vector<2x1xf32>
    %36 = math.exp %35 : vector<2x1xf32>
    %cst_12 = arith.constant 1.000000e+00 : f32
    %37 = vector.broadcast %cst_12 : f32 to vector<2x1xf32>
    %38 = arith.addf %37, %36 : vector<2x1xf32>
    %39 = arith.divf %37, %38 : vector<2x1xf32>
    %c0_13 = arith.constant 0 : index
    %c0_14 = arith.constant 0 : index
    %40 = vector.load %arg5[%c0_13, %c0_14] : memref<2x1xf32, #tpu.memory_space<vmem>>, vector<2x1xf32>
    tpu.vector_store %arg5[%c0_13, %c0_14], %39 {strides = array<i32>} : memref<2x1xf32, #tpu.memory_space<vmem>>, vector<2x1xf32>,
    return
  }
}

</mosaic_0001>

<bundles_post_ra>
// kernel: tpu_custom_call.1
= control target key start
LH: loop header
LB: loop body
LE: loop exit
PB: predicated region body
PF: predicated region fallthrough
CT: control target
= control target key end

     0   :  { %s1549_s0 = inlined_call_operand.vmem [shape: f32[2,1], index: 0, kind: input, shape index: {}]   ;;  %s1550_s1 = inlined_call_operand.hbm [shape: f32[1,3072], index: 1, kind: input, shape index: {}]   ;;  %s1551_s2 = inlined_call_operand.hbm [shape: f32[1,3072], index: 2, kind: input, shape index: {}]   ;;  %s1552_s3 = inlined_call_operand.hbm [shape: f32[1,1024], index: 3, kind: input, shape index: {}]   ;;  %s1553_s4 = inlined_call_operand.<no memory space> [shape: f32[1,1], index: 4, kind: input, shape index: {}]   ;;  %s1554_s5 = inlined_call_operand.vmem [shape: f32[2,1], index: 5, kind: output, shape index: {}]  }
   0x1   :  { %v10_v0 = vstv %s1553_s4 }
   0x2   :  { %11 = vst [vmem:[#allocation2] sm:$0x1] %v10_v0 }
   0x3   :  { %12 = vsyncpa [#allocation4], 0 }
   0x4   :  { %13 = vsyncpa [#allocation6], 0  ;;  %s32_s22 = sshll.u32 %s1551_s2, 4  ;;  %s837_s23 = smov [#allocation5]   ;;  %s33_s22 = int_to_ptr.hbm [resolvable:$true] %s32_s22 }
   0x5   :  { %s34_s24 = sshll.u32 %s837_s23, 4  ;;  %s21_s27 = sshll.u32 %s1550_s1, 4  ;;  %s35_s24 = int_to_ptr.vmem [resolvable:$true] %s34_s24  ;;  %s22_s27 = int_to_ptr.hbm [resolvable:$true] %s21_s27 }
   0x6   :  { %37 = dma.hbm_to_vmem [thread:$0]  %s33_s22, 384, %s35_s24, [#allocation6]  }
   0x7   :  { %s838_s28 = smov [#allocation3]   ;;  %s43_s6 = sshll.u32 %s1552_s3, 4  ;;  %s44_s6 = int_to_ptr.hbm [resolvable:$true] %s43_s6 }
   0x8   :  { %s23_s29 = sshll.u32 %s838_s28, 4  ;;  %s839_s2 = smov [#allocation7]   ;;  %s24_s29 = int_to_ptr.vmem [resolvable:$true] %s23_s29 }
   0x9   :  { %26 = dma.hbm_to_vmem [thread:$0]  %s22_s27, 384, %s24_s29, [#allocation4]  }
   0xa   :  { %s45_s7 = sshll.u32 %s839_s2, 4  ;;  %s46_s7 = int_to_ptr.vmem [resolvable:$true] %s45_s7 }
   0xb   :  { %48 = dma.hbm_to_vmem [thread:$0]  %s44_s6, 128, %s46_s7, [#allocation6]  }
   0xc   :  { %833 = dma.done.wait [#allocation4], 384  }
   0xd   :  { %834 = vsyncadd [#allocation4], 4294966912 }
   0xe   :  { %835 = dma.done.wait [#allocation6], 512  }
   0xf   :  { %836 = vsyncadd [#allocation6], 4294966784  ;;  %v840_v1 = vmov 0   ;;  %v63_v2 = vld [vmem:[%s1549_s0] sm:$0x3]  ;;  %v896_v16 = vld [vmem:[#allocation3 + $0x8] sm:$0xff] }
  0x10   :  { %659 = vset.pattern.permute.xlu0 %v840_v1  ;;  %v64_v3 = vld [vmem:[#allocation3] sm:$0xff]  ;;  %v886_v7 = vld [vmem:[#allocation5] sm:$0xff]  ;;  %v900_v25 = vld [vmem:[#allocation3 + $0x10] sm:$0xff]  ;;  %v83_v27 = vperm.slane %v896_v16, 0  ;;  %v84_v28 = vperm.slane %v896_v16, 1  ;;  %v85_v34 = vperm.slane %v896_v16, 2 }
  0x11   :  { %69 = vperm.xlu0 %659, %v63_v2   ;;  %v75_v4 = vperm.slane %v64_v3, 0  ;;  %v76_v5 = vperm.slane %v64_v3, 1  ;;  %v77_v6 = vperm.slane %v64_v3, 2  ;;  %v153_v9 = vperm.slane %v886_v7, 0  ;;  %v916_v45 = vld [vmem:[#allocation5 + $0x8] sm:$0xff]  ;;  %v929_v61 = vld [vmem:[#allocation5 + $0x10] sm:$0xff] }
  0x12   :  { %v154_v10 = vperm.slane %v886_v7, 1  ;;  %v155_v14 = vperm.slane %v886_v7, 2  ;;  %v78_v15 = vperm.slane %v64_v3, 3  ;;  %v79_v17 = vperm.slane %v64_v3, 4 }
  0x13   :  { %v80_v21 = vperm.slane %v64_v3, 5  ;;  %v156_v23 = vperm.slane %v886_v7, 3  ;;  %v81_v24 = vperm.slane %v64_v3, 6  ;;  %v82_v26 = vperm.slane %v64_v3, 7 }
  0x14   :  { %v157_v29 = vperm.slane %v886_v7, 4  ;;  %v158_v36 = vperm.slane %v886_v7, 5  ;;  %v86_v38 = vperm.slane %v896_v16, 3  ;;  %v87_v39 = vperm.slane %v896_v16, 4 }
  0x15   :  { %v88_v40 = vperm.slane %v896_v16, 5  ;;  %v89_v41 = vperm.slane %v896_v16, 6  ;;  %v90_v42 = vperm.slane %v896_v16, 7  ;;  %v91_v43 = vperm.slane %v900_v25, 0 }
  0x16   :  { %v159_v46 = vperm.slane %v886_v7, 6  ;;  %v92_v48 = vperm.slane %v900_v25, 1  ;;  %v93_v49 = vperm.slane %v900_v25, 2  ;;  %v94_v52 = vperm.slane %v900_v25, 3 }
  0x17   :  { %v95_v53 = vperm.slane %v900_v25, 4  ;;  %v160_v55 = vperm.slane %v886_v7, 7  ;;  %v96_v56 = vperm.slane %v900_v25, 5  ;;  %v97_v57 = vperm.slane %v900_v25, 6 }
  0x18   :  { %v98_v58 = vperm.slane %v900_v25, 7  ;;  %v161_v59 = vperm.slane %v916_v45, 0  ;;  %v162_v62 = vperm.slane %v916_v45, 1  ;;  %v163_v63 = vperm.slane %v916_v45, 2 }
  0x19   :  { %v164_v3 = vperm.slane %v916_v45, 3  ;;  %v166_v7 = vperm.slane %v916_v45, 5 }
  0x83   :  { %v888_v8 = vpop.permute.xlu0 %69 }
  0x84   :  { %v123_v11 = vmul.f32 %v75_v4, %v888_v8  ;;  %v124_v12 = vmul.f32 %v76_v5, %v888_v8  ;;  %v125_v13 = vmul.f32 %v77_v6, %v888_v8  ;;  %v126_v22 = vmul.f32 %v78_v15, %v888_v8 }
  0x85   :  { %v127_v30 = vmul.f32 %v79_v17, %v888_v8  ;;  %v128_v35 = vmul.f32 %v80_v21, %v888_v8  ;;  %v129_v44 = vmul.f32 %v81_v24, %v888_v8  ;;  %v130_v54 = vmul.f32 %v82_v26, %v888_v8 }
  0x86   :  { %v201_v18 = vadd.f32 %v153_v9, %v123_v11  ;;  %v202_v19 = vadd.f32 %v154_v10, %v124_v12  ;;  %v203_v20 = vadd.f32 %v155_v14, %v125_v13  ;;  %v204_v37 = vadd.f32 %v156_v23, %v126_v22 }
  0x87   :  { %v205_v47 = vadd.f32 %v157_v29, %v127_v30  ;;  %v206_v50 = vadd.f32 %v158_v36, %v128_v35  ;;  %v207_v0 = vadd.f32 %v159_v46, %v129_v44  ;;  %v165_v4 = vperm.slane %v916_v45, 4 }
  0x88   :  { %v638_v31 = vmul.f32 -1.442695, %v201_v18  ;;  %v639_v32 = vmul.f32 -1.442695, %v202_v19  ;;  %v640_v33 = vmul.f32 -1.442695, %v203_v20  ;;  %v208_v10 = vadd.f32 %v160_v55, %v130_v54 }
  0x89   :  { %v641_v51 = vmul.f32 -1.442695, %v204_v37  ;;  %v642_v1 = vmul.f32 -1.442695, %v205_v47  ;;  %v643_v5 = vmul.f32 -1.442695, %v206_v50  ;;  %v131_v29 = vmul.f32 %v83_v27, %v888_v8 }
  0x8a   :  { %661 = vpow2.f32 %v638_v31  ;;  %v167_v9 = vperm.slane %v916_v45, 6  ;;  %v168_v12 = vperm.slane %v916_v45, 7  ;;  %v169_v13 = vperm.slane %v929_v61, 0 }
  0x8b   :  { %663 = vpow2.f32 %v639_v32  ;;  %v170_v14 = vperm.slane %v929_v61, 1  ;;  %v171_v17 = vperm.slane %v929_v61, 2  ;;  %v172_v18 = vperm.slane %v929_v61, 3 }
  0x8c   :  { %665 = vpow2.f32 %v640_v33  ;;  %v644_v19 = vmul.f32 -1.442695, %v207_v0  ;;  %v173_v20 = vperm.slane %v929_v61, 4  ;;  %v174_v21 = vperm.slane %v929_v61, 5 }
  0x8d   :  { %667 = vpow2.f32 %v641_v51  ;;  %v175_v23 = vperm.slane %v929_v61, 6  ;;  %v176_v24 = vperm.slane %v929_v61, 7  ;;  %v645_v25 = vmul.f32 -1.442695, %v208_v10 }
  0x8e   :  { %669 = vpow2.f32 %v642_v1  ;;  %v132_v30 = vmul.f32 %v84_v28, %v888_v8  ;;  %v133_v31 = vmul.f32 %v85_v34, %v888_v8  ;;  %v134_v32 = vmul.f32 %v86_v38, %v888_v8 }
  0x8f   :  { %671 = vpow2.f32 %v643_v5  ;;  %v135_v33 = vmul.f32 %v87_v39, %v888_v8  ;;  %v136_v35 = vmul.f32 %v88_v40, %v888_v8  ;;  %v137_v36 = vmul.f32 %v89_v41, %v888_v8 }
  0x90   :  { %v662_v60 = vpop.eup %661  ;;  %v138_v27 = vmul.f32 %v90_v42, %v888_v8  ;;  %v139_v37 = vmul.f32 %v91_v43, %v888_v8  ;;  %v140_v16 = vmul.f32 %v92_v48, %v888_v8  ;;  %v141_v34 = vmul.f32 %v93_v49, %v888_v8 }
  0x91   :  { %v664_v2 = vpop.eup %663  ;;  %v937_v11 = vadd.f32 1.0, %v662_v60  ;;  %v142_v40 = vmul.f32 %v94_v52, %v888_v8  ;;  %v143_v44 = vmul.f32 %v95_v53, %v888_v8  ;;  %v144_v41 = vmul.f32 %v96_v56, %v888_v8 }
  0x92   :  { %v666_v6 = vpop.eup %665  ;;  %v942_v15 = vadd.f32 1.0, %v664_v2  ;;  %v145_v42 = vmul.f32 %v97_v57, %v888_v8  ;;  %v146_v45 = vmul.f32 %v98_v58, %v888_v8  ;;  %v209_v46 = vadd.f32 %v161_v59, %v131_v29 }
  0x93   :  { %v948_v22 = vadd.f32 1.0, %v666_v6  ;;  %673 = vrcp.f32 %v937_v11  ;;  %v668_v26 = vpop.eup %667  ;;  %v210_v47 = vadd.f32 %v162_v62, %v132_v30  ;;  %v211_v48 = vadd.f32 %v163_v63, %v133_v31 }
  0x94   :  { %675 = vrcp.f32 %v942_v15  ;;  %v670_v28 = vpop.eup %669  ;;  %v972_v38 = vadd.f32 1.0, %v668_v26  ;;  %v983_v50 = vadd.f32 %v164_v3, %v134_v32  ;;  %v985_v51 = vadd.f32 %v165_v4, %v135_v33 }
  0x95   :  { %677 = vpow2.f32 %v644_v19  ;;  %v672_v39 = vpop.eup %671  ;;  %v987_v52 = vadd.f32 %v166_v7, %v136_v35  ;;  %v989_v53 = vadd.f32 1.0, %v670_v28  ;;  %v991_v55 = vadd.f32 %v167_v9, %v137_v36 }
  0x96   :  { %679 = vrcp.f32 %v948_v22  ;;  %v217_v56 = vadd.f32 %v169_v13, %v139_v37  ;;  %v218_v57 = vadd.f32 %v170_v14, %v140_v16  ;;  %v996_v58 = vadd.f32 %v168_v12, %v138_v27 }
  0x97   :  { %681 = vpow2.f32 %v645_v25  ;;  %v219_v59 = vadd.f32 %v171_v17, %v141_v34  ;;  %v220_v60 = vadd.f32 %v172_v18, %v142_v40  ;;  %v221_v61 = vadd.f32 %v173_v20, %v143_v44 }
  0x98   :  { %683 = vrcp.f32 %v972_v38  ;;  %v222_v63 = vadd.f32 %v174_v21, %v144_v41  ;;  %v998_v0 = vadd.f32 1.0, %v672_v39  ;;  %v223_v3 = vadd.f32 %v175_v23, %v145_v42 }
  0x99   :  { %v978_v43 = vpop.eup %673  ;;  %v1004_v4 = vadd.f32 %v176_v24, %v146_v45  ;;  %685 = vrcp.f32 %v989_v53  ;;  %v1011_v7 = vmul.f32 -1.442695, %v217_v56  ;;  %v1013_v9 = vmul.f32 -1.442695, %v218_v57 }
  0x9a   :  { %v981_v49 = vpop.eup %675  ;;  %v258_v1 = vmul.f32 %v978_v43, %v937_v11  ;;  %687 = vtanh.f32 %v209_v46  ;;  %v1017_v12 = vmul.f32 -1.442695, %v219_v59  ;;  %v1019_v13 = vmul.f32 -1.442695, %v220_v60 }
  0x9b   :  { %v678_v54 = vpop.eup %677  ;;  %v273_v2 = vmul.f32 %v981_v49, %v942_v15  ;;  %689 = vtanh.f32 %v210_v47  ;;  %v1024_v19 = vmul.f32 -1.442695, %v221_v61  ;;  %v268_v20 = vand.u32 2147483648, %v937_v11 }
  0x9c   :  { %v994_v8 = vpop.eup %679  ;;  %v1006_v5 = vadd.f32 1.0, %v678_v54  ;;  %v259_v17 = vsub.f32 1.0, %v258_v1  ;;  %691 = vrcp.f32 %v998_v0  ;;  %v1028_v21 = vmul.f32 -1.442695, %v222_v63 }
  0x9d   :  { %v682_v62 = vpop.eup %681  ;;  %v288_v6 = vmul.f32 %v994_v8, %v948_v22  ;;  %v274_v18 = vsub.f32 1.0, %v273_v2  ;;  %v1030_v23 = vmul.f32 -1.442695, %v223_v3  ;;  %v266_v24 = vand.u32 2147483647, %v937_v11 }
  0x9e   :  { %v1015_v10 = vadd.f32 1.0, %v682_v62  ;;  %v1021_v14 = vpop.eup %683  ;;  %693 = vrcp.f32 %v1006_v5  ;;  %v281_v25 = vand.u32 2147483647, %v942_v15  ;;  %vm262_vm0 = vweird.f32 %v937_v11 }
  0x9f   :  { %v289_v26 = vsub.f32 1.0, %v288_v6  ;;  %695 = vtanh.f32 %v211_v48  ;;  %v1034_v29 = vpop.eup %685  ;;  %v283_v30 = vand.u32 2147483648, %v942_v15  ;;  %v303_v31 = vmul.f32 %v1021_v14, %v972_v38 }
  0xa0   :  { %697 = vrcp.f32 %v1015_v10  ;;  %v1041_v32 = vpop.eup %687  ;;  %v260_v33 = vmul.f32 %v978_v43, %v259_v17  ;;  %v275_v35 = vmul.f32 %v981_v49, %v274_v18  ;;  %v296_v36 = vand.u32 2147483647, %v948_v22 }
  0xa1   :  { %v298_v27 = vand.u32 2147483648, %v948_v22  ;;  %v1047_v37 = vpop.eup %689  ;;  %v269_v28 = vor.u32 1.1754944e-38, %v268_v20  ;;  %vm277_vm1 = vweird.f32 %v942_v15  ;;  %vm292_vm2 = vweird.f32 %v948_v22 }
  0xa2   :  { %v313_v16 = vand.u32 2147483648, %v972_v38  ;;  %v1052_v34 = vpop.eup %691  ;;  %vm1054_vm3 = vcmp.eq.f32.partialorder %v266_v24, 8.507059e+37  ;;  %vm1058_vm4 = vcmp.eq.f32.partialorder %v281_v25, 8.507059e+37  ;;  %v290_v44 = vmul.f32 %v994_v8, %v289_v26 }
  0xa3   :  { %v318_v41 = vmul.f32 %v1034_v29, %v989_v53  ;;  %v328_v42 = vand.u32 2147483648, %v989_v53  ;;  %vm263_vm5 = vweird.f32 %v978_v43  ;;  %v284_v46 = vor.u32 1.1754944e-38, %v283_v30 }
  0xa4   :  { %v1066_v45 = vpop.eup %693  ;;  %v304_v47 = vsub.f32 1.0, %v303_v31  ;;  %v311_v48 = vand.u32 2147483647, %v972_v38  ;;  %v261_v56 = vadd.f32 %v978_v43, %v260_v33  ;;  %v276_v57 = vadd.f32 %v981_v49, %v275_v35  ;;  %vm1092_vm10 = vmor %vm262_vm0, %vm263_vm5 }
  0xa5   :  { %v1070_v54 = vpop.eup %695  ;;  %vm278_vm6 = vweird.f32 %v981_v49  ;;  %vm1075_vm7 = vcmp.eq.f32.partialorder %v296_v36, 8.507059e+37  ;;  %v299_v60 = vor.u32 1.1754944e-38, %v298_v27  ;;  %vm293_vm8 = vweird.f32 %v994_v8 }
  0xa6   :  { %v1079_v61 = vpop.eup %697  ;;  %vm307_vm9 = vweird.f32 %v972_v38  ;;  %v1083_v62 = vor.u32 1.1754944e-38, %v313_v16  ;;  %v326_v63 = vand.u32 2147483647, %v989_v53  ;;  %v333_v1 = vmul.f32 %v1052_v34, %v998_v0  ;;  %vm1103_vm11 = vmor %vm277_vm1, %vm278_vm6 }
  0xa7   :  { %v291_v3 = vadd.f32 %v994_v8, %v290_v44  ;;  %v319_v6 = vsub.f32 1.0, %v318_v41  ;;  %v1097_v17 = vor.u32 1.1754944e-38, %v328_v42  ;;  %v348_v18 = vmul.f32 %v1066_v45, %v1006_v5  ;;  %vm1124_vm12 = vmor %vm292_vm2, %vm293_vm8 }
  0xa8   :  { %v305_v11 = vmul.f32 %v1021_v14, %v304_v47  ;;  %v341_v24 = vand.u32 2147483647, %v998_v0  ;;  %v343_v25 = vand.u32 2147483648, %v998_v0  ;;  %699 = vpow2.f32 %v1011_v7 }
  0xa9   :  { %v265_v26 = vsel %vm1092_vm10, %v978_v43, %v261_v56  ;;  %v280_v15 = vsel %vm1103_vm11, %v981_v49, %v276_v57  ;;  %v363_v30 = vmul.f32 %v1079_v61, %v1015_v10  ;;  %701 = vpow2.f32 %v1013_v9 }
  0xaa   :  { %vm308_vm13 = vweird.f32 %v1021_v14  ;;  %vm322_vm14 = vweird.f32 %v989_v53  ;;  %vm323_vm15 = vweird.f32 %v1034_v29  ;;  %v334_v43 = vsub.f32 1.0, %v333_v1 }
  0xab   :  { %703 = vpow2.f32 %v1017_v12  ;;  %v295_v49 = vsel %vm1124_vm12, %v994_v8, %v291_v3  ;;  %v320_v7 = vmul.f32 %v1034_v29, %v319_v6  ;;  %v349_v22 = vsub.f32 1.0, %v348_v18  ;;  %vm1172_vm5 = vmor %vm307_vm9, %vm308_vm13 }
  0xac   :  { %705 = vpow2.f32 %v1019_v13  ;;  %v1139_v9 = vsel %vm1054_vm3, %v269_v28, %v265_v26  ;;  %v1143_v33 = vsel %vm1058_vm4, %v284_v46, %v280_v15  ;;  %v306_v35 = vadd.f32 %v1021_v14, %v305_v11  ;;  %vm1209_vm8 = vmor %vm322_vm14, %vm323_vm15 }
  0xad   :  { %vm337_vm0 = vweird.f32 %v998_v0  ;;  %707 = vpow2.f32 %v1024_v19  ;;  %vm1148_vm1 = vcmp.eq.f32.partialorder %v311_v48, 8.507059e+37  ;;  %vm338_vm2 = vweird.f32 %v1052_v34 }
  0xae   :  { %v1153_v12 = vor.u32 1.1754944e-38, %v343_v25  ;;  %vm352_vm3 = vweird.f32 %v1006_v5  ;;  %v364_v13 = vsub.f32 1.0, %v363_v30  ;;  %709 = vpow2.f32 %v1028_v21  ;;  %v700_v36 = vpop.eup %699  ;;  %vm1232_vm10 = vmor %vm337_vm0, %vm338_vm2 }
  0xaf   :  { %v1159_v27 = vsel %vm1075_vm7, %v299_v60, %v295_v49  ;;  %vm1161_vm4 = vcmp.eq.f32.partialorder %v326_v63, 8.507059e+37  ;;  %v335_v28 = vmul.f32 %v1052_v34, %v334_v43  ;;  %v356_v16 = vand.u32 2147483647, %v1006_v5  ;;  %v702_v39 = vpop.eup %701 }
  0xb0   :  { %711 = vtanh.f32 %v983_v50  ;;  %v321_v40 = vadd.f32 %v1034_v29, %v320_v7  ;;  %v350_v44 = vmul.f32 %v1066_v45, %v349_v22  ;;  %v1179_v41 = vadd.f32 1.0, %v700_v36 }
  0xb1   :  { %713 = vtanh.f32 %v985_v51  ;;  %v704_v42 = vpop.eup %703  ;;  %v310_v50 = vsel %vm1172_vm5, %v1021_v14, %v306_v35  ;;  %vm1184_vm6 = vcmp.eq.f32.partialorder %v341_v24, 8.507059e+37  ;;  %v358_v38 = vand.u32 2147483648, %v1006_v5 }
  0xb2   :  { %715 = vtanh.f32 %v987_v52  ;;  %v1190_v47 = vadd.f32 1.0, %v702_v39  ;;  %v706_v48 = vpop.eup %705  ;;  %v365_v51 = vmul.f32 %v1079_v61, %v364_v13  ;;  %v653_v56 = vmul.f32 -1.442695, %v1004_v4 }
  0xb3   :  { %v1194_v57 = vadd.f32 1.0, %v704_v42  ;;  %717 = vrcp.f32 %v1179_v41  ;;  %v708_v14 = vpop.eup %707  ;;  %v336_v59 = vadd.f32 %v1052_v34, %v335_v28  ;;  %vm1198_vm7 = vcmp.eq.f32.partialorder %v356_v16, 8.507059e+37 }
  0xb4   :  { %v1202_v63 = vadd.f32 1.0, %v706_v48  ;;  %719 = vrcp.f32 %v1190_v47  ;;  %v710_v52 = vpop.eup %709  ;;  %v351_v1 = vadd.f32 %v1066_v45, %v350_v44  ;;  %vm353_vm9 = vweird.f32 %v1066_v45 }
  0xb5   :  { %721 = vpow2.f32 %v1030_v23  ;;  %v1216_v2 = vadd.f32 1.0, %v708_v14  ;;  %v325_v6 = vsel %vm1209_vm8, %v1034_v29, %v321_v40  ;;  %v371_v53 = vand.u32 2147483647, %v1015_v10  ;;  %vm1253_vm13 = vmor %vm352_vm3, %vm353_vm9 }
  0xb6   :  { %v1218_v3 = vpop.eup %711  ;;  %v373_v18 = vand.u32 2147483648, %v1015_v10  ;;  %723 = vrcp.f32 %v1194_v57  ;;  %v366_v11 = vadd.f32 %v1079_v61, %v365_v51  ;;  %vm367_vm11 = vweird.f32 %v1015_v10 }
  0xb7   :  { %v1226_v20 = vpop.eup %713  ;;  %vm368_vm12 = vweird.f32 %v1079_v61  ;;  %725 = vpow2.f32 %v653_v56  ;;  %v1244_v24 = vsel %vm1148_vm1, %v1083_v62, %v310_v50  ;;  %v340_v0 = vsel %vm1232_vm10, %v1052_v34, %v336_v59 }
  0xb8   :  { %v1239_v29 = vpop.eup %715  ;;  %v1257_v26 = vadd.f32 1.0, %v710_v52  ;;  %727 = vrcp.f32 %v1202_v63  ;;  %v1265_v62 = vsel %vm1161_vm4, %v1097_v17, %v325_v6  ;;  %v355_v34 = vsel %vm1253_vm13, %v1066_v45, %v351_v1  ;;  %vm1275_vm14 = vmor %vm367_vm11, %vm368_vm12 }
  0xb9   :  { %v1260_v15 = vpop.eup %717  ;;  %v359_v5 = vor.u32 1.1754944e-38, %v358_v38  ;;  %729 = vrcp.f32 %v1216_v2  ;;  %vm1279_vm15 = vcmp.eq.f32.partialorder %v371_v53, 8.507059e+37  ;;  %v374_v17 = vor.u32 1.1754944e-38, %v373_v18 }
  0xba   :  { %v1271_v30 = vpop.eup %719  ;;  %731 = vtanh.f32 %v991_v55  ;;  %v418_v45 = vmul.f32 %v1260_v15, %v1179_v41  ;;  %v1289_v7 = vsel %vm1184_vm6, %v1153_v12, %v340_v0  ;;  %v370_v10 = vsel %vm1275_vm14, %v1079_v61, %v366_v11 }
  0xbb   :  { %v722_v49 = vpop.eup %721  ;;  %733 = vtanh.f32 %v996_v58  ;;  %v433_v22 = vmul.f32 %v1271_v30, %v1190_v47  ;;  %v1301_v55 = vsel %vm1198_vm7, %v359_v5, %v355_v34  ;;  %v428_v13 = vand.u32 2147483648, %v1179_v41 }
  0xbc   :  { %v1297_v35 = vpop.eup %723  ;;  %v419_v8 = vsub.f32 1.0, %v418_v45  ;;  %735 = vrcp.f32 %v1257_v26  ;;  %v426_v36 = vand.u32 2147483647, %v1179_v41  ;;  %v443_v58 = vand.u32 2147483648, %v1190_v47 }
  0xbd   :  { %v726_v12 = vpop.eup %725  ;;  %v434_v61 = vsub.f32 1.0, %v433_v22  ;;  %v448_v19 = vmul.f32 %v1297_v35, %v1194_v57  ;;  %v1313_v16 = vsel %vm1279_vm15, %v374_v17, %v370_v10  ;;  %v1315_v39 = vadd.f32 1.0, %v722_v49 }
  0xbe   :  { %v1309_v28 = vpop.eup %727  ;;  %vm422_vm0 = vweird.f32 %v1179_v41  ;;  %v441_v21 = vand.u32 2147483647, %v1190_v47  ;;  %v420_v44 = vmul.f32 %v1260_v15, %v419_v8  ;;  %vm437_vm1 = vweird.f32 %v1190_v47 }
  0xbf   :  { %v1319_v40 = vpop.eup %729  ;;  %v449_v42 = vsub.f32 1.0, %v448_v19  ;;  %v463_v50 = vmul.f32 %v1309_v28, %v1202_v63  ;;  %v429_v38 = vor.u32 1.1754944e-38, %v428_v13  ;;  %v435_v48 = vmul.f32 %v1271_v30, %v434_v61 }
  0xc0   :  { %v1325_v46 = vpop.eup %731  ;;  %vm452_vm2 = vweird.f32 %v1194_v57  ;;  %v478_v51 = vmul.f32 %v1319_v40, %v1216_v2  ;;  %v1333_v14 = vadd.f32 1.0, %v726_v12  ;;  %vm1335_vm3 = vcmp.eq.f32.partialorder %v426_v36, 8.507059e+37 }
  0xc1   :  { %v1331_v56 = vpop.eup %733  ;;  %v444_v60 = vor.u32 1.1754944e-38, %v443_v58  ;;  %v456_v52 = vand.u32 2147483647, %v1194_v57  ;;  %v458_v4 = vand.u32 2147483648, %v1194_v57  ;;  %vm1343_vm4 = vcmp.eq.f32.partialorder %v441_v21, 8.507059e+37 }
  0xc2   :  { %v1341_v1 = vpop.eup %735  ;;  %v450_v53 = vmul.f32 %v1297_v35, %v449_v42  ;;  %v464_v18 = vsub.f32 1.0, %v463_v50  ;;  %v471_v23 = vand.u32 2147483647, %v1202_v63  ;;  %737 = vrcp.f32 %v1315_v39 }
  0xc3   :  { %v421_v11 = vadd.f32 %v1260_v15, %v420_v44  ;;  %vm423_vm5 = vweird.f32 %v1260_v15  ;;  %v473_v0 = vand.u32 2147483648, %v1202_v63  ;;  %v479_v25 = vsub.f32 1.0, %v478_v51 }
  0xc4   :  { %v436_v34 = vadd.f32 %v1271_v30, %v435_v48  ;;  %vm438_vm6 = vweird.f32 %v1271_v30  ;;  %v488_v5 = vand.u32 2147483648, %v1216_v2  ;;  %v493_v31 = vmul.f32 %v1341_v1, %v1257_v26  ;;  %vm1366_vm9 = vmor %vm422_vm0, %vm423_vm5 }
  0xc5   :  { %vm1358_vm7 = vcmp.eq.f32.partialorder %v456_v52, 8.507059e+37  ;;  %v459_v17 = vor.u32 1.1754944e-38, %v458_v4  ;;  %vm467_vm8 = vweird.f32 %v1202_v63  ;;  %v486_v45 = vand.u32 2147483647, %v1216_v2  ;;  %vm1379_vm12 = vmor %vm437_vm1, %vm438_vm6 }
  0xc6   :  { %v451_v10 = vadd.f32 %v1297_v35, %v450_v53  ;;  %vm453_vm10 = vweird.f32 %v1297_v35  ;;  %v465_v22 = vmul.f32 %v1309_v28, %v464_v18  ;;  %vm482_vm11 = vweird.f32 %v1216_v2 }
  0xc7   :  { %v425_v8 = vsel %vm1366_vm9, %v1260_v15, %v421_v11  ;;  %v480_v13 = vmul.f32 %v1319_v40, %v479_v25  ;;  %v494_v12 = vsub.f32 1.0, %v493_v31  ;;  %739 = vrcp.f32 %v1333_v14  ;;  %vm1397_vm14 = vmor %vm452_vm2, %vm453_vm10 }
  0xc8   :  { %v1385_v36 = vpop.eup %737  ;;  %v440_v61 = vsel %vm1379_vm12, %v1271_v30, %v436_v34  ;;  %vm1390_vm13 = vcmp.eq.f32.partialorder %v471_v23, 8.507059e+37  ;;  %v474_v47 = vor.u32 1.1754944e-38, %v473_v0  ;;  %v489_v15 = vor.u32 1.1754944e-38, %v488_v5  ;;  %v1473_v34 = vld [vmem:[#allocation7] sm:$0xff] }
  0xc9   :  { %v503_v19 = vand.u32 2147483648, %v1257_v26  ;;  %vm468_vm15 = vweird.f32 %v1309_v28  ;;  %vm483_vm0 = vweird.f32 %v1319_v40  ;;  %vm1403_vm1 = vcmp.eq.f32.partialorder %v486_v45, 8.507059e+37 }
  0xca   :  { %v501_v44 = vand.u32 2147483647, %v1257_v26  ;;  %v508_v42 = vmul.f32 %v1385_v36, %v1315_v39  ;;  %v430_v57 = vsel %vm1335_vm3, %v429_v38, %v425_v8  ;;  %v455_v50 = vsel %vm1397_vm14, %v1297_v35, %v451_v10  ;;  %vm1451_vm5 = vmor %vm482_vm11, %vm483_vm0 }
  0xcb   :  { %v466_v48 = vadd.f32 %v1309_v28, %v465_v22  ;;  %vm497_vm2 = vweird.f32 %v1257_v26  ;;  %v537_v51 = vmul.f32 %v1041_v32, %v1139_v9  ;;  %v445_v52 = vsel %vm1343_vm4, %v444_v60, %v440_v61  ;;  %vm1436_vm4 = vmor %vm467_vm8, %vm468_vm15 }
  0xcc   :  { %v481_v4 = vadd.f32 %v1319_v40, %v480_v13  ;;  %v495_v53 = vmul.f32 %v1341_v1, %v494_v12  ;;  %v538_v38 = vmul.f32 %v1047_v37, %v1143_v33  ;;  %vm498_vm3 = vweird.f32 %v1341_v1 }
  0xcd   :  { %v504_v35 = vor.u32 1.1754944e-38, %v503_v19  ;;  %v509_v59 = vsub.f32 1.0, %v508_v42  ;;  %v539_v18 = vmul.f32 %v1070_v54, %v1159_v27  ;;  %v1428_v23 = vpop.eup %739  ;;  %v460_v32 = vsel %vm1358_vm7, %v459_v17, %v455_v50  ;;  %vm1491_vm10 = vmor %vm497_vm2, %vm498_vm3 }
  0xce   :  { %v516_v37 = vand.u32 2147483647, %v1315_v39  ;;  %v518_v33 = vand.u32 2147483648, %v1315_v39  ;;  %v540_v54 = vmul.f32 %v1218_v3, %v1244_v24  ;;  %v470_v27 = vsel %vm1436_vm4, %v1309_v28, %v466_v48 }
  0xcf   :  { %vm1455_vm6 = vcmp.eq.f32.partialorder %v501_v44, 8.507059e+37  ;;  %vm512_vm7 = vweird.f32 %v1315_v39  ;;  %v523_v3 = vmul.f32 %v1428_v23, %v1333_v14  ;;  %v541_v24 = vmul.f32 %v1226_v20, %v1265_v62 }
  0xd0   :  { %741 = vtanh.f32 %v537_v51  ;;  %v485_v2 = vsel %vm1451_vm5, %v1319_v40, %v481_v4  ;;  %v496_v28 = vadd.f32 %v1341_v1, %v495_v53  ;;  %v542_v6 = vmul.f32 %v1239_v29, %v1289_v7 }
  0xd1   :  { %743 = vtanh.f32 %v538_v38  ;;  %v510_v11 = vmul.f32 %v1385_v36, %v509_v59  ;;  %v524_v0 = vsub.f32 1.0, %v523_v3  ;;  %v543_v25 = vmul.f32 %v1325_v46, %v1301_v55 }
  0xd2   :  { %745 = vtanh.f32 %v539_v18  ;;  %v475_v20 = vsel %vm1390_vm13, %v474_v47, %v470_v27  ;;  %vm527_vm8 = vweird.f32 %v1333_v14  ;;  %v544_v62 = vmul.f32 %v1331_v56, %v1313_v16 }
  0xd3   :  { %747 = vtanh.f32 %v540_v54  ;;  %v490_v29 = vsel %vm1403_vm1, %v489_v15, %v485_v2  ;;  %vm1482_vm9 = vcmp.eq.f32.partialorder %v516_v37, 8.507059e+37  ;;  %v519_v55 = vor.u32 1.1754944e-38, %v518_v33 }
  0xd4   :  { %v525_v40 = vmul.f32 %v1428_v23, %v524_v0  ;;  %749 = vtanh.f32 %v541_v24  ;;  %vm513_vm11 = vweird.f32 %v1385_v36  ;;  %v531_v16 = vand.u32 2147483647, %v1333_v14 }
  0xd5   :  { %751 = vtanh.f32 %v542_v6  ;;  %v563_v56 = vperm.slane %v1473_v34, 0  ;;  %v500_v31 = vsel %vm1491_vm10, %v1341_v1, %v496_v28  ;;  %v511_v43 = vadd.f32 %v1385_v36, %v510_v11  ;;  %vm1513_vm14 = vmor %vm512_vm7, %vm513_vm11 }
  0xd6   :  { %v742_v5 = vpop.eup %741  ;;  %753 = vtanh.f32 %v543_v25  ;;  %v564_v26 = vperm.slane %v1473_v34, 1  ;;  %vm528_vm12 = vweird.f32 %v1428_v23  ;;  %v565_v49 = vperm.slane %v1473_v34, 2 }
  0xd7   :  { %v744_v17 = vpop.eup %743  ;;  %755 = vtanh.f32 %v544_v62  ;;  %v553_v45 = vmul.f32 %v742_v5, %v430_v57  ;;  %v526_v22 = vadd.f32 %v1428_v23, %v525_v40  ;;  %v566_v41 = vperm.slane %v1473_v34, 3  ;;  %vm1526_vm15 = vmor %vm527_vm8, %vm528_vm12 }
  0xd8   :  { %v746_v10 = vpop.eup %745  ;;  %v554_v8 = vmul.f32 %v744_v17, %v445_v52  ;;  %vm587_vm13 = vcmask 1041408   ;;  %v505_v13 = vsel %vm1455_vm6, %v504_v35, %v500_v31  ;;  %v533_v61 = vand.u32 2147483648, %v1333_v14 }
  0xd9   :  { %v748_v1 = vpop.eup %747  ;;  %v555_v58 = vmul.f32 %v746_v10, %v460_v32  ;;  %v579_v47 = vmul.f32 %v563_v56, %v553_v45  ;;  %v515_v19 = vsel %vm1513_vm14, %v1385_v36, %v511_v43  ;;  %v567_v30 = vperm.slane %v1473_v34, 4 }
  0xda   :  { %v750_v15 = vpop.eup %749  ;;  %v556_v21 = vmul.f32 %v748_v1, %v475_v20  ;;  %v580_v44 = vmul.f32 %v564_v26, %v554_v8  ;;  %v568_v50 = vperm.slane %v1473_v34, 5  ;;  %v530_v52 = vsel %vm1526_vm15, %v1428_v23, %v526_v22 }
  0xdb   :  { %v752_v42 = vpop.eup %751  ;;  %v557_v57 = vmul.f32 %v750_v15, %v490_v29  ;;  %v581_v48 = vmul.f32 %v565_v49, %v555_v58  ;;  %v588_v51 = vsel %vm587_vm13, %v579_v47, 0.0  ;;  %v520_v35 = vsel %vm1482_vm9, %v519_v55, %v515_v19 }
  0xdc   :  { %v754_v36 = vpop.eup %753  ;;  %v558_v4 = vmul.f32 %v752_v42, %v505_v13  ;;  %v582_v53 = vmul.f32 %v566_v41, %v556_v21  ;;  %v589_v38 = vsel %vm587_vm13, %v580_v44, 0.0  ;;  %vm532_vm0 = vcmp.eq.f32.partialorder %v531_v16, 8.507059e+37 }
  0xdd   :  { %v756_v14 = vpop.eup %755  ;;  %v534_v59 = vor.u32 1.1754944e-38, %v533_v61  ;;  %v590_v18 = vadd.f32 %v589_v38, %v588_v51  ;;  %v559_v32 = vmul.f32 %v754_v36, %v520_v35  ;;  %v569_v9 = vperm.slane %v1473_v34, 6 }
  0xde   :  { %v583_v37 = vmul.f32 %v567_v30, %v557_v57  ;;  %v591_v33 = vsel %vm587_vm13, %v581_v48, 0.0  ;;  %v570_v63 = vperm.slane %v1473_v34, 7  ;;  %v584_v60 = vmul.f32 %v568_v50, %v558_v4  ;;  %v660_v34 = vld [vmem:[#allocation2] ss:$0 sm:$0xff] }
  0xdf   :  { %v535_v54 = vsel %vm532_vm0, %v534_v59, %v530_v52  ;;  %v592_v27 = vadd.f32 %v591_v33, %v590_v18  ;;  %v593_v3 = vsel %vm587_vm13, %v582_v53, 0.0  ;;  %v585_v2 = vmul.f32 %v569_v9, %v559_v32 }
  0xe0   :  { %v560_v23 = vmul.f32 %v756_v14, %v535_v54  ;;  %v595_v28 = vsel %vm587_vm13, %v583_v37, 0.0  ;;  %v597_v0 = vsel %vm587_vm13, %v584_v60, 0.0  ;;  %vm630_vm4 = vcmask 1024  }
  0xe1   :  { %v594_v24 = vadd.f32 %v593_v3, %v592_v27  ;;  %v599_v20 = vsel %vm587_vm13, %v585_v2, 0.0 }
  0xe2   :  { %v586_v11 = vmul.f32 %v570_v63, %v560_v23 }
  0xe3   :  { %v596_v6 = vadd.f32 %v595_v28, %v594_v24 }
  0xe4   :  { %v601_v29 = vsel %vm587_vm13, %v586_v11, 0.0 }
  0xe5   :  { %v598_v25 = vadd.f32 %v597_v0, %v596_v6 }
  0xe7   :  { %v600_v62 = vadd.f32 %v599_v20, %v598_v25 }
  0xe9   :  { %v602_v7 = vadd.f32 %v601_v29, %v600_v62 }
  0xeb   :  { %603 = vadd.xlane.f32.xlu0 %v602_v7 }
 0x15e   :  { %v604_v55 = vpop.xlane.xlu0 %603 }
 0x15f   :  { %v609_v40 = vadd.f32 %v660_v34, %v604_v55 }
 0x161   :  { %v610_v46 = vmax.f32 %v609_v40, 0.0 }
 0x163   :  { %v654_v16 = vmul.f32 -1.442695, %v610_v46 }
 0x165   :  { %757 = vpow2.f32 %v654_v16 }
 0x16b   :  { %v758_v56 = vpop.eup %757 }
 0x16c   :  { %v614_v5 = vadd.f32 1.0, %v758_v56 }
 0x16e   :  { %759 = vrcp.f32 %v614_v5  ;;  %v626_v17 = vand.u32 2147483648, %v614_v5  ;;  %v624_v49 = vand.u32 2147483647, %v614_v5  ;;  %vm620_vm2 = vweird.f32 %v614_v5 }
 0x170   :  { %v627_v22 = vor.u32 1.1754944e-38, %v626_v17  ;;  %vm625_vm5 = vcmp.eq.f32.partialorder %v624_v49, 8.507059e+37 }
 0x174   :  { %v760_v31 = vpop.eup %759 }
 0x175   :  { %v616_v43 = vmul.f32 %v760_v31, %v614_v5  ;;  %vm621_vm1 = vweird.f32 %v760_v31 }
 0x176   :  { %vm622_vm3 = vmor %vm620_vm2, %vm621_vm1 }
 0x177   :  { %v617_v26 = vsub.f32 1.0, %v616_v43 }
 0x179   :  { %v618_v45 = vmul.f32 %v760_v31, %v617_v26 }
 0x17b   :  { %v619_v10 = vadd.f32 %v760_v31, %v618_v45 }
 0x17d   :  { %v623_v8 = vsel %vm622_vm3, %v760_v31, %v619_v10 }
 0x17e   :  { %v628_v41 = vsel %vm625_vm5, %v627_v22, %v623_v8 }
 0x17f   :  { %631 = vst.msk [vmem:[%s1554_s5] sm:$0x3] %vm630_vm4, %v628_v41 }
 0x180   :  { %636 = vsyncpa [#allocation4], 1 }
 0x181   :  { %637 = vsyncpa [#allocation6], 1 }

</bundles_post_ra>
